<compile_context>
chip_gen: v7x
topology: tpu7x:2x2x1
jax: 0.10.0
libtpu: 0.0.40
codegen_flags: <defaults>
</compile_context>

<pallas_src>
import functools

import jax
import jax.numpy as jnp
from jax.experimental import pallas as pl
from jax.experimental.pallas import tpu as pltpu


# ---------------------------------------------------------------------------
# helpers
# ---------------------------------------------------------------------------
def _largest_tile(size, target, align):
    """Largest multiple of `align` that divides `size` and is <= target.
    Falls back to the full dimension (always a legal block size)."""
    if size <= target:
        return size
    t = (target // align) * align
    while t >= align:
        if size % t == 0:
            return t
        t -= align
    return size


# ---------------------------------------------------------------------------
# Kernel 1: data consistency  (DataConsistencyLayer of RDN_HABs_M3_DCs)
# ---------------------------------------------------------------------------
def _dc_kernel(k_ref, k0_ref, m_ref, o_ref, *, noise_lvl):
    m = m_ref[...]
    k = k_ref[...]
    if noise_lvl is None:                                   # static (trace-time) branch
        o_ref[...] = (1.0 - m) * k + m * k0_ref[...]
    else:
        v = float(noise_lvl)
        inv = 1.0 / (1.0 + v)                               # trace-time constant: no vector divide
        o_ref[...] = (1.0 - m) * k + m * ((k + v * k0_ref[...]) * inv)


@functools.partial(jax.jit, static_argnames=("noise_lvl",))
def data_consistency_forward(k, k0, mask, *, noise_lvl=None):
    """out = (1-mask)*k + mask*k0   (or the noise-weighted variant).

    Lane-dense retiling: flatten to (rows, lane) with lane in {512,384,256,128},
    tile rows over a parallel grid, and alias the output onto k's buffer.
    """
    orig_shape = k.shape
    mask = jnp.broadcast_to(mask, orig_shape).astype(k.dtype)   # supports (B,1,H,W) masks
    total = k.size

    lane = next((c for c in (512, 384, 256, 128) if total % c == 0), None)
    if lane is None:
        # TODO(synk): lane-sparse fallback for volumes whose size is not a multiple of 128.
        lane = orig_shape[-1]
    rows = total // lane

    k2 = k.reshape(rows, lane)
    k02 = k0.reshape(rows, lane)
    m2 = mask.reshape(rows, lane)

    tr = _largest_tile(rows, 512, 8)          # ~512x512 f32 tiles: ~85% of HBM roofline

    out2 = pl.pallas_call(
        functools.partial(_dc_kernel, noise_lvl=noise_lvl),
        out_shape=jax.ShapeDtypeStruct((rows, lane), k.dtype),
        grid=(rows // tr,),
        in_specs=[
            pl.BlockSpec((tr, lane), lambda i: (i, 0)),
            pl.BlockSpec((tr, lane), lambda i: (i, 0)),
            pl.BlockSpec((tr, lane), lambda i: (i, 0)),
        ],
        out_specs=pl.BlockSpec((tr, lane), lambda i: (i, 0)),
        input_output_aliases={0: 0},          # reuse k's HBM buffer in the cascade
        compiler_params=pltpu.CompilerParams(dimension_semantics=("parallel",)),
    )(k2, k02, m2)
    return out2.reshape(orig_shape)


# ---------------------------------------------------------------------------
# Kernel 2: fused (matmul + bias) linear projection, weight VMEM-resident
# ---------------------------------------------------------------------------
def _linear_kernel(x_ref, w_ref, b_ref, o_ref):
    # x: (1, tm, Din) f32/bf16   w: (Din, Dout) bf16   b: (1, Dout) f32   o: (1, tm, Dout)
    # Cast x to bf16 on the VPU inside the kernel: avoids a separate full-tensor XLA
    # cast pass (read f32 once instead of f32->bf16->re-read bf16).
    x = x_ref[0].astype(jnp.bfloat16)
    acc = jnp.dot(x, w_ref[...], preferred_element_type=jnp.float32)
    o_ref[0] = (acc + b_ref[...]).astype(o_ref.dtype)


def _linear(x, w_bf16, b_f32, out_dtype, tm_target=512):
    """y = x @ w + b, tiled over (batch, row-tile). The whole (Din, Dout) bf16 weight
    and bias stay VMEM-resident (constant block index) — no per-step weight re-DMA."""
    B, N, Din = x.shape
    Dout = w_bf16.shape[1]
    tm = _largest_tile(N, tm_target, 16)       # bf16 packs 16 rows per sublane group
    return pl.pallas_call(
        _linear_kernel,
        out_shape=jax.ShapeDtypeStruct((B, N, Dout), out_dtype),
        grid=(B, N // tm),
        in_specs=[
            pl.BlockSpec((1, tm, Din), lambda b, i: (b, i, 0)),
            # Whole weight / bias, index constant across the grid -> fetched once.
            # TODO(synk): pipeline_mode=pl.Buffered(1) would also drop their redundant
            # second buffer and free VMEM for a larger tm (matters most on v7x).
            pl.BlockSpec((Din, Dout), lambda b, i: (0, 0)),
            pl.BlockSpec((1, Dout), lambda b, i: (0, 0)),
        ],
        out_specs=pl.BlockSpec((1, tm, Dout), lambda b, i: (b, i, 0)),
        compiler_params=pltpu.CompilerParams(
            dimension_semantics=("parallel", "parallel")),
    )(x, w_bf16, b_f32.reshape(1, Dout))


# ---------------------------------------------------------------------------
# Kernel 3: flash-style multi-head attention, head split/merge via index_maps
# ---------------------------------------------------------------------------
def _attn_kernel(q_ref, k_ref, v_ref, o_ref, m_sc, l_sc, acc_sc, *, hpb, hd):
    # q: (1, N, bw) bf16 (scale folded into w_qkv)   k/v: (1, tk, bw) bf16
    # scratch: m/l (hpb, N, 1) f32, acc (hpb, N, hd) f32 — live across the KV axis.
    kv = pl.program_id(2)

    @pl.when(kv == 0)
    def _():
        m_sc[...] = jnp.full_like(m_sc, -jnp.inf)
        l_sc[...] = jnp.zeros_like(l_sc)
        acc_sc[...] = jnp.zeros_like(acc_sc)

    # Load each block once; slice the in-register values per head (no per-head
    # masked 64-lane ref accesses).
    q = q_ref[0]
    k = k_ref[0]
    v = v_ref[0]

    for h in range(hpb):                                    # static, fully unrolled
        lo = h * hd
        qh = q[:, lo:lo + hd]
        kh = k[:, lo:lo + hd]
        vh = v[:, lo:lo + hd]
        # scores: contract the LAST dims of q and k — no explicit k transpose (XLU).
        s = jax.lax.dot_general(qh, kh, (((1,), (1,)), ((), ())),
                                preferred_element_type=jnp.float32)   # (N, tk) f32
        m_prev = m_sc[h]
        m_new = jnp.maximum(m_prev, jnp.max(s, axis=-1, keepdims=True))
        alpha = jnp.exp(m_prev - m_new)
        p = jnp.exp(s - m_new)
        l_sc[h] = alpha * l_sc[h] + jnp.sum(p, axis=-1, keepdims=True)
        acc_sc[h] = alpha * acc_sc[h] + jnp.dot(
            p.astype(vh.dtype), vh, preferred_element_type=jnp.float32)
        m_sc[h] = m_new

    @pl.when(kv == pl.num_programs(2) - 1)
    def _():
        # Assemble all heads of the group and do ONE full-width (>=128-lane) store.
        outs = [acc_sc[h] * pl.reciprocal(l_sc[h], approx=True) for h in range(hpb)]
        o_ref[0] = jnp.concatenate(outs, axis=-1).astype(o_ref.dtype)


def attention_forward(x, params, num_heads, *, kv_tile_target=512):
    """Multi-head self-attention (HAB attention core) as 3 Pallas kernels, no XLA glue."""
    B, N, D = x.shape
    hd = D // num_heads
    scale = float(hd) ** (-0.5)                # matches PyTorch (dim/num_heads)**-0.5
    w_qkv, b_qkv, w_proj, b_proj = params

    # Fold the softmax scale into the q-columns of w_qkv / b_qkv in f32 (better
    # numerics than a bf16 per-head multiply, and removes a VPU op per head).
    col_scale = jnp.concatenate(
        [jnp.full((D,), scale, jnp.float32), jnp.ones((2 * D,), jnp.float32)])
    w_qkv = w_qkv * col_scale[None, :]
    b_qkv = b_qkv * col_scale

    # Weights cast to bf16 once per call (in a real model they would be stored bf16);
    # activations are cast inside the linear kernels.
    w_qkv_bf = w_qkv.astype(jnp.bfloat16)
    w_proj_bf = w_proj.astype(jnp.bfloat16)

    # --- 1) qkv projection, weight VMEM-resident; stored bf16 ----------------------
    # TODO(synk): for G < 6 head groups it is a net HBM win to fuse this projection
    # into the attention kernel (skip the (B,N,3D) intermediate entirely).
    qkv = _linear(x, w_qkv_bf, b_qkv, out_dtype=jnp.bfloat16)          # (B, N, 3D)

    # --- 2) flash-style attention: head split AND merge purely in index_maps -------
    if hd >= 128:
        hpb = 1
    else:                                       # group heads until >= 128 lanes/block
        hpb = min(num_heads, max(1, 128 // hd))
        while num_heads % hpb != 0:
            hpb -= 1
    G = num_heads // hpb                        # head groups per q/k/v region
    bw = hpb * hd                               # block width along the qkv column axis
    tk = _largest_tile(N, kv_tile_target, 16)   # KV tile bounds the (N, tk) score slab
    nk = N // tk
    # NOTE: hd=64 under-fills the 256-wide MXU on v6e/v7x; hd=128 would be the fix if
    # head_dim is a free design parameter in RDN_HABs_M3.

    attn = pl.pallas_call(
        functools.partial(_attn_kernel, hpb=hpb, hd=hd),
        out_shape=jax.ShapeDtypeStruct((B, N, D), jnp.bfloat16),
        grid=(B, G, nk),
        in_specs=[
            pl.BlockSpec((1, N, bw), lambda b, g, kv: (b, 0, g)),           # q heads
            pl.BlockSpec((1, tk, bw), lambda b, g, kv: (b, kv, G + g)),     # k tile
            pl.BlockSpec((1, tk, bw), lambda b, g, kv: (b, kv, 2 * G + g)), # v tile
        ],
        # written directly into merged (B, N, D) layout -> no head-merge transpose.
        out_specs=pl.BlockSpec((1, N, bw), lambda b, g, kv: (b, 0, g)),
        scratch_shapes=[
            pltpu.VMEM((hpb, N, 1), jnp.float32),    # running max  m
            pltpu.VMEM((hpb, N, 1), jnp.float32),    # running sum  l
            pltpu.VMEM((hpb, N, hd), jnp.float32),   # accumulator
        ],
        compiler_params=pltpu.CompilerParams(
            dimension_semantics=("parallel", "parallel", "arbitrary")),
    )(qkv, qkv, qkv)

    # --- 3) output projection (f32 result); dropouts are 0.0 -> identity -----------
    return _linear(attn, w_proj_bf, b_proj, out_dtype=jnp.float32)      # (B, N, D)


# ---------------------------------------------------------------------------
# Pure-JAX references (correctness checks only)
# ---------------------------------------------------------------------------
def attention_reference(x, params, num_heads):
    B, N, D = x.shape
    hd = D // num_heads
    scale = float(D / num_heads) ** (-0.5)
    w_qkv, b_qkv, w_proj, b_proj = params
    qkv = x @ w_qkv + b_qkv
    qkv = qkv.reshape(B, N, 3, num_heads, hd).transpose(2, 0, 3, 1, 4)
    q, k, v = qkv[0], qkv[1], qkv[2]
    att = jnp.einsum("bhnd,bhmd->bhnm", q, k) * scale
    att = jax.nn.softmax(att, axis=-1)
    out = jnp.einsum("bhnm,bhmd->bhnd", att, v)
    out = out.transpose(0, 2, 1, 3).reshape(B, N, D)
    return out @ w_proj + b_proj


# ---------------------------------------------------------------------------
if __name__ == "__main__":
    key = jax.random.PRNGKey(0)
    k_dc, k_dc0, k_m, kx, kw1, kb1, kw2, kb2 = jax.random.split(key, 8)

    # --- DataConsistencyLayer (top-level cascade glue) -----------------------------
    kspace = jax.random.normal(k_dc, (2, 2, 16, 16), jnp.float32)
    kspace0 = jax.random.normal(k_dc0, (2, 2, 16, 16), jnp.float32)
    # broadcastable (B,1,H,W) mask, as the PyTorch layer commonly receives
    mask = (jax.random.uniform(k_m, (2, 1, 16, 16)) > 0.5).astype(jnp.float32)
    mask_b = jnp.broadcast_to(mask, kspace.shape)

    dc_ref = (1.0 - mask_b) * kspace + mask_b * kspace0
    dc_out = jax.block_until_ready(data_consistency_forward(kspace, kspace0, mask))
    assert jnp.allclose(dc_out, dc_ref, atol=1e-6, rtol=1e-6), "DC mismatch"

    v = 0.05
    dc_ref_n = (1.0 - mask_b) * kspace + mask_b * (kspace + v * kspace0) / (1.0 + v)
    dc_out_n = jax.block_until_ready(
        data_consistency_forward(kspace, kspace0, mask, noise_lvl=v))
    assert jnp.allclose(dc_out_n, dc_ref_n, atol=1e-5, rtol=1e-5), "DC (noise) mismatch"

    # --- HAB attention core ---------------------------------------------------------
    B, N, D, num_heads = 2, 128, 256, 4          # head_dim = 64 -> 2 heads per block

    bound = 1.0 / (D ** 0.5)                     # PyTorch-Linear-style uniform bound
    w_qkv = jax.random.uniform(kw1, (D, 3 * D), jnp.float32, -bound, bound)
    b_qkv = jax.random.uniform(kb1, (3 * D,), jnp.float32, -bound, bound)
    w_proj = jax.random.uniform(kw2, (D, D), jnp.float32, -bound, bound)
    b_proj = jax.random.uniform(kb2, (D,), jnp.float32, -bound, bound)
    params = (w_qkv, b_qkv, w_proj, b_proj)

    x = jax.random.normal(kx, (B, N, D), jnp.float32)

    out = jax.block_until_ready(attention_forward(x, params, num_heads))
    ref = attention_reference(x, params, num_heads)
    assert out.shape == (B, N, D)
    # bf16 MXU operands + approx reciprocal -> relaxed tolerance vs the f32 reference.
    assert jnp.allclose(out, ref, atol=5e-2, rtol=5e-2), "attention mismatch"

    print("KERNEL_OK")
</pallas_src>

<mosaic_0001>
module attributes {stable_mosaic.version = 11 : i64} {
  func.func @_dc_kernel(%arg0: i32, %arg1: memref<2x512xf32, #tpu.memory_space<vmem>>, %arg2: memref<2x512xf32, #tpu.memory_space<vmem>>, %arg3: memref<2x512xf32, #tpu.memory_space<vmem>>, %arg4: memref<2x512xf32, #tpu.memory_space<vmem>>) attributes {dimension_semantics = [#tpu.dimension_semantics<parallel>], iteration_bounds = array<i64: 1>, scalar_prefetch = 0 : i64, scratch_operands = 0 : i64, tpu.core_type = #tpu.core_type<tc>, window_params = [{transform_indices = @transform_0, window_bounds = array<i64: 2, 512>}, {transform_indices = @transform_1, window_bounds = array<i64: 2, 512>}, {transform_indices = @transform_2, window_bounds = array<i64: 2, 512>}, {transform_indices = @transform_3, window_bounds = array<i64: 2, 512>}]} {
    %c0 = arith.constant 0 : index
    %c0_0 = arith.constant 0 : index
    %0 = vector.load %arg3[%c0, %c0_0] : memref<2x512xf32, #tpu.memory_space<vmem>>, vector<2x512xf32>
    %c0_1 = arith.constant 0 : index
    %c0_2 = arith.constant 0 : index
    %1 = vector.load %arg1[%c0_1, %c0_2] : memref<2x512xf32, #tpu.memory_space<vmem>>, vector<2x512xf32>
    %cst = arith.constant 1.000000e+00 : f32
    %2 = vector.broadcast %cst : f32 to vector<2x512xf32>
    %3 = arith.subf %2, %0 : vector<2x512xf32>
    %4 = arith.mulf %3, %1 : vector<2x512xf32>
    %c0_3 = arith.constant 0 : index
    %c0_4 = arith.constant 0 : index
    %5 = vector.load %arg2[%c0_3, %c0_4] : memref<2x512xf32, #tpu.memory_space<vmem>>, vector<2x512xf32>
    %6 = arith.mulf %0, %5 : vector<2x512xf32>
    %7 = arith.addf %4, %6 : vector<2x512xf32>
    %c0_5 = arith.constant 0 : index
    %c0_6 = arith.constant 0 : index
    %8 = vector.load %arg4[%c0_5, %c0_6] : memref<2x512xf32, #tpu.memory_space<vmem>>, vector<2x512xf32>
    tpu.vector_store %arg4[%c0_5, %c0_6], %7 {strides = array<i32>} : memref<2x512xf32, #tpu.memory_space<vmem>>, vector<2x512xf32>,
    return
  }
  func.func @transform_0(%arg0: i32) -> (i32, i32) {
    %c0_i32 = arith.constant 0 : i32
    %c0_i32_0 = arith.constant 0 : i32
    return %arg0, %c0_i32 : i32, i32
  }
  func.func @transform_1(%arg0: i32) -> (i32, i32) {
    %c0_i32 = arith.constant 0 : i32
    %c0_i32_0 = arith.constant 0 : i32
    return %arg0, %c0_i32 : i32, i32
  }
  func.func @transform_2(%arg0: i32) -> (i32, i32) {
    %c0_i32 = arith.constant 0 : i32
    %c0_i32_0 = arith.constant 0 : i32
    return %arg0, %c0_i32 : i32, i32
  }
  func.func @transform_3(%arg0: i32) -> (i32, i32) {
    %c0_i32 = arith.constant 0 : i32
    %c0_i32_0 = arith.constant 0 : i32
    return %arg0, %c0_i32 : i32, i32
  }
}

</mosaic_0001>

<bundles_post_ra>
// kernel: data_consistency_forward.1
= control target key start
LH: loop header
LB: loop body
LE: loop exit
PB: predicated region body
PF: predicated region fallthrough
CT: control target
= control target key end

     0   :  { %s58_s0 = inlined_call_operand.vmem [shape: f32[2,512], index: 0, kind: input, shape index: {}, may-alias: {0,3}]   ;;  %s59_s1 = inlined_call_operand.vmem [shape: f32[2,512], index: 1, kind: input, shape index: {}]   ;;  %s60_s2 = inlined_call_operand.vmem [shape: f32[2,512], index: 2, kind: input, shape index: {}]   ;;  %s61_s3 = inlined_call_operand.vmem [shape: f32[2,512], index: 3, kind: output, shape index: {}, may-alias: {0,3}]  }
   0x1   :  { %v14_v0 = vld [vmem:[%s60_s2] sm:$0xff] }
   0x2   :  { %v15_v1 = vld [vmem:[%s58_s0] sm:$0xff]  ;;  %v16_v3 = vsub.f32 1.0, %v14_v0 }
   0x3   :  { %v18_v2 = vld [vmem:[%s59_s1] sm:$0xff] }
   0x4   :  { %v19_v4 = vmul.f32 %v18_v2, %v14_v0  ;;  %v17_v5 = vmul.f32 %v16_v3, %v15_v1 }
   0x6   :  { %v20_v6 = vadd.f32 %v19_v4, %v17_v5 }
   0x8   :  { %21 = vst [vmem:[%s61_s3] sm:$0xff] %v20_v6 }

</bundles_post_ra>
